<compile_context>
chip_gen: v5e
topology: v5e:2x2
jax: 0.10.0
libtpu: 0.0.40
codegen_flags: <defaults>
</compile_context>

<pallas_src>
import functools

import jax
import jax.numpy as jnp
from jax.experimental import pallas as pl
from jax.experimental.pallas import tpu as pltpu

# Fused output slab column layout (f32, 32 lanes):
#   cols 0:2   -> main_xy    (tanh)
#   cols 2:4   -> c_xy       (tanh)
#   col  4     -> L_val      (sigmoid)
#   col  5     -> R_val      (sigmoid)
#   cols 6:18  -> btn_logits (identity)
#   cols 18:30 -> btn_probs  (sigmoid of duplicated btn columns)
#   cols 30:32 -> padding (unspecified; sliced off by the wrapper)
HEAD_DIMS = (2, 2, 1, 1, 12)
OUT_DIM = sum(HEAD_DIMS)      # 18
N_HEADS = len(HEAD_DIMS)      # 5
N_BTN = 12
BTN_OFF = 6                   # btn logits start column
PROB_OFF = OUT_DIM            # btn probs start column (18)
OUT_WIDTH = 32                # narrow f32 output slab (30 useful + 2 pad)


def _heads_kernel(h_ref, w1_ref, b1_ref, w2_ref, b2_ref, out_ref):
    h = h_ref[...]                                     # (tb, D) bf16, streamed

    # First layer over the full fused width: one MXU push, K = D.
    z1 = jnp.dot(h, w1_ref[...], preferred_element_type=jnp.float32)
    z1 = jnp.maximum(z1 + b1_ref[...], 0.0)            # (tb, 5H) f32

    # Second layer over the full block-diagonal (5H, 32): one MXU push, K = 5H.
    z2 = jnp.dot(z1.astype(jnp.bfloat16), w2_ref[...],
                 preferred_element_type=jnp.float32) + b2_ref[...]   # (tb, 32)

    # Single EUP pass: tanh(x) = 2*sigmoid(2x) - 1.  Cols 18:30 reuse the same
    # sigmoid for btn_probs (their pre-activation is bitwise identical to the
    # btn_logits columns thanks to the duplicated W2/b2 columns).
    col = jax.lax.broadcasted_iota(jnp.int32, z2.shape, 1)
    is_tanh = col < 4
    s = jax.nn.sigmoid(jnp.where(is_tanh, 2.0 * z2, z2))
    out = jnp.where(is_tanh, 2.0 * s - 1.0,
          jnp.where(col < BTN_OFF, s,
          jnp.where(col < PROB_OFF, z2, s)))           # cols >= 30: pad, dropped
    out_ref[...] = out.astype(out_ref.dtype)


def _round_up(x, m):
    return (x + m - 1) // m * m


@functools.partial(jax.jit, static_argnames=("block_b", "interpret"))
def prediction_heads_forward(h_last, w1cat, b1cat, w2pad, b2pad, *,
                             block_b=2048, interpret=False):
    B, D = h_last.shape
    H5 = w1cat.shape[1]

    # Stream h as bf16 (the MXU consumes bf16 anyway): halves input HBM bytes.
    h_in = h_last.astype(jnp.bfloat16)

    # Batch tile: multiple of 16 (bf16 sublane packing), large enough to
    # amortize the ~0.35us per-grid-step overhead.  VMEM use is a few MB even
    # at tb=2048, far below every generation's limit (incl. v7x's 64 MiB).
    tb = min(block_b, _round_up(B, 16))
    # v7x megacore: keep the 1-D grid length >= 2 so both TensorCores get work.
    if B > 32 and _round_up(B, tb) // tb < 2:
        tb = _round_up((B + 1) // 2, 16)
    b_pad = _round_up(B, tb)
    if b_pad != B:
        # Pad only the remainder rows; fuses with the bf16 cast under jit.
        h_in = jnp.pad(h_in, ((0, b_pad - B), (0, 0)))

    flops = 2 * b_pad * D * H5 + 2 * b_pad * H5 * OUT_WIDTH
    bytes_accessed = (h_in.size * h_in.dtype.itemsize
                      + w1cat.size * w1cat.dtype.itemsize
                      + b1cat.size * b1cat.dtype.itemsize
                      + w2pad.size * w2pad.dtype.itemsize
                      + b2pad.size * b2pad.dtype.itemsize
                      + b_pad * OUT_WIDTH * 4)

    out = pl.pallas_call(
        _heads_kernel,
        out_shape=jax.ShapeDtypeStruct((b_pad, OUT_WIDTH), jnp.float32),
        grid=(b_pad // tb,),
        in_specs=[
            pl.BlockSpec((tb, D), lambda i: (i, 0)),           # h: streamed per step
            pl.BlockSpec((D, H5), lambda i: (0, 0)),           # weights: resident
            pl.BlockSpec((1, H5), lambda i: (0, 0)),
            pl.BlockSpec((H5, OUT_WIDTH), lambda i: (0, 0)),
            pl.BlockSpec((1, OUT_WIDTH), lambda i: (0, 0)),
        ],
        out_specs=pl.BlockSpec((tb, OUT_WIDTH), lambda i: (i, 0)),
        compiler_params=pltpu.CompilerParams(
            dimension_semantics=("parallel",),    # batch axis shards across TCs
            vmem_limit_bytes=32 * 1024 * 1024,    # not a constraint for this kernel
        ),
        cost_estimate=pl.CostEstimate(
            flops=int(flops),
            transcendentals=int(b_pad * OUT_WIDTH),   # single sigmoid pass
            bytes_accessed=int(bytes_accessed),
        ),
        interpret=interpret,
    )(h_in, w1cat, b1cat, w2pad, b2pad)

    return dict(
        main_xy=out[:B, 0:2],
        c_xy=out[:B, 2:4],
        L_val=out[:B, 4:5],
        R_val=out[:B, 5:6],
        btn_logits=out[:B, BTN_OFF:BTN_OFF + N_BTN],
        btn_probs=out[:B, PROB_OFF:PROB_OFF + N_BTN],
    )


def init_params(key, d_model, hidden):
    """Deterministically initialize the 5 heads and fuse them.

    Returns (fused_params, raw_params):
      fused_params = (w1cat bf16 (D, 5H), b1cat f32 (1, 5H),
                      w2pad bf16 (5H, 32), b2pad f32 (1, 32))
      raw_params   = f32 per-head weights for the plain-JAX reference.
    """
    keys = jax.random.split(key, 4 * N_HEADS)
    w1s, b1s, w2s, b2s = [], [], [], []
    for i, out_dim in enumerate(HEAD_DIMS):
        k0, k1, k2, k3 = keys[4 * i:4 * i + 4]
        w1s.append(jax.random.normal(k0, (d_model, hidden), jnp.float32) * 0.05)
        b1s.append(jax.random.normal(k1, (hidden,), jnp.float32) * 0.05)
        w2s.append(jax.random.normal(k2, (hidden, out_dim), jnp.float32) * 0.05)
        b2s.append(jax.random.normal(k3, (out_dim,), jnp.float32) * 0.05)

    w1cat = jnp.concatenate(w1s, axis=1)             # (d_model, 5*hidden)
    b1cat = jnp.concatenate(b1s, axis=0)[None, :]    # (1, 5*hidden), kept f32

    # Block-diagonal second layer, padded to a 32-wide output slab.
    w2pad = jnp.zeros((N_HEADS * hidden, OUT_WIDTH), jnp.float32)
    b2pad = jnp.zeros((1, OUT_WIDTH), jnp.float32)
    col = 0
    for i, out_dim in enumerate(HEAD_DIMS):
        w2pad = w2pad.at[i * hidden:(i + 1) * hidden, col:col + out_dim].set(w2s[i])
        b2pad = b2pad.at[0, col:col + out_dim].set(b2s[i])
        col += out_dim
    # Duplicate the btn head into cols 18:30 so the kernel's single sigmoid
    # pass over the slab directly yields btn_probs (no second transcendental
    # pass, no second output stream).
    w2pad = w2pad.at[(N_HEADS - 1) * hidden:, PROB_OFF:PROB_OFF + N_BTN].set(w2s[-1])
    b2pad = b2pad.at[0, PROB_OFF:PROB_OFF + N_BTN].set(b2s[-1])

    fused = (w1cat.astype(jnp.bfloat16), b1cat,
             w2pad.astype(jnp.bfloat16), b2pad)
    raw = (w1s, b1s, w2s, b2s)
    return fused, raw


def reference_forward(h, raw_params):
    """Plain-JAX f32 reference mirroring the PyTorch module."""
    w1s, b1s, w2s, b2s = raw_params
    outs = []
    for i in range(N_HEADS):
        z = jnp.maximum(h @ w1s[i] + b1s[i], 0.0) @ w2s[i] + b2s[i]
        outs.append(z)
    main_xy = jnp.tanh(outs[0])
    c_xy = jnp.tanh(outs[1])
    L_val = jax.nn.sigmoid(outs[2])
    R_val = jax.nn.sigmoid(outs[3])
    btn_logits = outs[4]
    return dict(main_xy=main_xy, c_xy=c_xy, L_val=L_val, R_val=R_val,
                btn_logits=btn_logits, btn_probs=jax.nn.sigmoid(btn_logits))


def threshold_buttons(btn_probs, btn_threshold=0.5):
    # Mirrors PredictionHeads.threshold_buttons (torch returns int64; int32 here).
    return (btn_probs >= btn_threshold).astype(jnp.int32)


if __name__ == "__main__":
    B, D_MODEL, HIDDEN = 2, 32, 64

    key = jax.random.PRNGKey(0)
    k_h, k_p = jax.random.split(key)
    h_last = jax.random.normal(k_h, (B, D_MODEL), jnp.float32)

    fused, raw = init_params(k_p, D_MODEL, HIDDEN)

    out = prediction_heads_forward(h_last, *fused)
    jax.block_until_ready(out)

    # Reference is pure f32; the kernel uses bf16 inputs/weights on the MXU and
    # tanh via 2*sigmoid(2x)-1, so compare with a relaxed tolerance.
    ref = reference_forward(h_last, raw)
    for name in ("main_xy", "c_xy", "L_val", "R_val", "btn_logits", "btn_probs"):
        assert out[name].shape == ref[name].shape, name
        err = float(jnp.max(jnp.abs(out[name] - ref[name])))
        assert jnp.allclose(out[name], ref[name], atol=2e-2, rtol=2e-2), (name, err)

    _ = threshold_buttons(out["btn_probs"])

    print("KERNEL_OK")
</pallas_src>

<mosaic_0001>
module attributes {stable_mosaic.version = 11 : i64} {
  func.func @_heads_kernel(%arg0: i32, %arg1: memref<16x32xbf16, #tpu.memory_space<vmem>>, %arg2: memref<32x320xbf16, #tpu.memory_space<vmem>>, %arg3: memref<1x320xf32, #tpu.memory_space<vmem>>, %arg4: memref<320x32xbf16, #tpu.memory_space<vmem>>, %arg5: memref<1x32xf32, #tpu.memory_space<vmem>>, %arg6: memref<16x32xf32, #tpu.memory_space<vmem>>) attributes {dimension_semantics = [#tpu.dimension_semantics<parallel>], iteration_bounds = array<i64: 1>, scalar_prefetch = 0 : i64, scratch_operands = 0 : i64, tpu.core_type = #tpu.core_type<tc>, window_params = [{transform_indices = @transform_0, window_bounds = array<i64: 16, 32>}, {pipeline_mode = #tpu.pipeline_mode<synchronous>, transform_indices = @transform_1, window_bounds = array<i64: 32, 320>}, {pipeline_mode = #tpu.pipeline_mode<synchronous>, transform_indices = @transform_2, window_bounds = array<i64: 1, 320>}, {pipeline_mode = #tpu.pipeline_mode<synchronous>, transform_indices = @transform_3, window_bounds = array<i64: 320, 32>}, {pipeline_mode = #tpu.pipeline_mode<synchronous>, transform_indices = @transform_4, window_bounds = array<i64: 1, 32>}, {transform_indices = @transform_5, window_bounds = array<i64: 16, 32>}]} {
    %c0 = arith.constant 0 : index
    %c0_0 = arith.constant 0 : index
    %0 = vector.load %arg1[%c0, %c0_0] : memref<16x32xbf16, #tpu.memory_space<vmem>>, vector<16x32xbf16>
    %c0_1 = arith.constant 0 : index
    %c0_2 = arith.constant 0 : index
    %1 = vector.load %arg2[%c0_1, %c0_2] : memref<32x320xbf16, #tpu.memory_space<vmem>>, vector<32x320xbf16>
    %cst = arith.constant dense<0.000000e+00> : vector<16x320xf32>
    %2 = tpu.matmul %0, %1, %cst {dimension_numbers = #tpu.dot_dimension_numbers<[1], [0], [0], [1], [0, 0, 1, 1], [], []>} : vector<16x32xbf16>, vector<32x320xbf16>, vector<16x320xf32> -> vector<16x320xf32>
    %c0_3 = arith.constant 0 : index
    %c0_4 = arith.constant 0 : index
    %3 = vector.load %arg3[%c0_3, %c0_4] : memref<1x320xf32, #tpu.memory_space<vmem>>, vector<1x320xf32>
    %4 = vector.broadcast %3 : vector<1x320xf32> to vector<16x320xf32>
    %5 = arith.addf %2, %4 : vector<16x320xf32>
    %cst_5 = arith.constant 0.000000e+00 : f32
    %6 = vector.broadcast %cst_5 : f32 to vector<16x320xf32>
    %7 = arith.maximumf %5, %6 : vector<16x320xf32>
    %8 = arith.truncf %7 : vector<16x320xf32> to vector<16x320xbf16>
    %c0_6 = arith.constant 0 : index
    %c0_7 = arith.constant 0 : index
    %9 = vector.load %arg4[%c0_6, %c0_7] : memref<320x32xbf16, #tpu.memory_space<vmem>>, vector<320x32xbf16>
    %cst_8 = arith.constant dense<0.000000e+00> : vector<16x32xf32>
    %10 = tpu.matmul %8, %9, %cst_8 {dimension_numbers = #tpu.dot_dimension_numbers<[1], [0], [0], [1], [0, 0, 1, 1], [], []>} : vector<16x320xbf16>, vector<320x32xbf16>, vector<16x32xf32> -> vector<16x32xf32>
    %c0_9 = arith.constant 0 : index
    %c0_10 = arith.constant 0 : index
    %11 = vector.load %arg5[%c0_9, %c0_10] : memref<1x32xf32, #tpu.memory_space<vmem>>, vector<1x32xf32>
    %12 = vector.broadcast %11 : vector<1x32xf32> to vector<16x32xf32>
    %13 = arith.addf %10, %12 : vector<16x32xf32>
    %14 = tpu.iota {dimensions = array<i32: 1>} : vector<16x32xi32>
    %c4_i32 = arith.constant 4 : i32
    %15 = vector.broadcast %c4_i32 : i32 to vector<16x32xi32>
    %16 = arith.cmpi slt, %14, %15 : vector<16x32xi32>
    %cst_11 = arith.constant 2.000000e+00 : f32
    %17 = vector.broadcast %cst_11 : f32 to vector<16x32xf32>
    %18 = arith.mulf %17, %13 : vector<16x32xf32>
    %19 = arith.select %16, %18, %13 : vector<16x32xi1>, vector<16x32xf32>
    %20 = arith.negf %19 : vector<16x32xf32>
    %21 = math.exp %20 : vector<16x32xf32>
    %cst_12 = arith.constant 1.000000e+00 : f32
    %22 = vector.broadcast %cst_12 : f32 to vector<16x32xf32>
    %23 = arith.addf %22, %21 : vector<16x32xf32>
    %24 = arith.divf %22, %23 : vector<16x32xf32>
    %cst_13 = arith.constant 2.000000e+00 : f32
    %25 = vector.broadcast %cst_13 : f32 to vector<16x32xf32>
    %26 = arith.mulf %25, %24 : vector<16x32xf32>
    %cst_14 = arith.constant 1.000000e+00 : f32
    %27 = vector.broadcast %cst_14 : f32 to vector<16x32xf32>
    %28 = arith.subf %26, %27 : vector<16x32xf32>
    %c6_i32 = arith.constant 6 : i32
    %29 = vector.broadcast %c6_i32 : i32 to vector<16x32xi32>
    %30 = arith.cmpi slt, %14, %29 : vector<16x32xi32>
    %c18_i32 = arith.constant 18 : i32
    %31 = vector.broadcast %c18_i32 : i32 to vector<16x32xi32>
    %32 = arith.cmpi slt, %14, %31 : vector<16x32xi32>
    %33 = arith.select %32, %13, %24 : vector<16x32xi1>, vector<16x32xf32>
    %34 = arith.select %30, %24, %33 : vector<16x32xi1>, vector<16x32xf32>
    %35 = arith.select %16, %28, %34 : vector<16x32xi1>, vector<16x32xf32>
    %c0_15 = arith.constant 0 : index
    %c0_16 = arith.constant 0 : index
    %36 = vector.load %arg6[%c0_15, %c0_16] : memref<16x32xf32, #tpu.memory_space<vmem>>, vector<16x32xf32>
    tpu.vector_store %arg6[%c0_15, %c0_16], %35 {strides = array<i32>} : memref<16x32xf32, #tpu.memory_space<vmem>>, vector<16x32xf32>,
    return
  }
  func.func @transform_0(%arg0: i32) -> (i32, i32) {
    %c0_i32 = arith.constant 0 : i32
    %c0_i32_0 = arith.constant 0 : i32
    return %arg0, %c0_i32 : i32, i32
  }
  func.func @transform_1(%arg0: i32) -> (i32, i32) {
    %c0_i32 = arith.constant 0 : i32
    %c0_i32_0 = arith.constant 0 : i32
    %c0_i32_1 = arith.constant 0 : i32
    return %c0_i32, %c0_i32_0 : i32, i32
  }
  func.func @transform_2(%arg0: i32) -> (i32, i32) {
    %c0_i32 = arith.constant 0 : i32
    %c0_i32_0 = arith.constant 0 : i32
    %c0_i32_1 = arith.constant 0 : i32
    return %c0_i32, %c0_i32_0 : i32, i32
  }
  func.func @transform_3(%arg0: i32) -> (i32, i32) {
    %c0_i32 = arith.constant 0 : i32
    %c0_i32_0 = arith.constant 0 : i32
    %c0_i32_1 = arith.constant 0 : i32
    return %c0_i32, %c0_i32_0 : i32, i32
  }
  func.func @transform_4(%arg0: i32) -> (i32, i32) {
    %c0_i32 = arith.constant 0 : i32
    %c0_i32_0 = arith.constant 0 : i32
    %c0_i32_1 = arith.constant 0 : i32
    return %c0_i32, %c0_i32_0 : i32, i32
  }
  func.func @transform_5(%arg0: i32) -> (i32, i32) {
    %c0_i32 = arith.constant 0 : i32
    %c0_i32_0 = arith.constant 0 : i32
    return %arg0, %c0_i32 : i32, i32
  }
}

</mosaic_0001>

<bundles_post_ra>
// kernel: prediction_heads_forward.1
= control target key start
LH: loop header
LB: loop body
LE: loop exit
PB: predicated region body
PF: predicated region fallthrough
CT: control target
= control target key end

     0   :  { %vm76_vm0 = vcmask 261120   ;;  %vm295_vm1 = vcmask 523264   ;;  %s723_s1 = inlined_call_operand.vmem [shape: bf16[32,320], index: 1, kind: input, shape index: {}]   ;;  %s724_s3 = inlined_call_operand.vmem [shape: bf16[320,32], index: 3, kind: input, shape index: {}]   ;;  %s725_s0 = inlined_call_operand.vmem [shape: bf16[16,32], index: 0, kind: input, shape index: {}]   ;;  %s726_s2 = inlined_call_operand.vmem [shape: f32[1,320], index: 2, kind: input, shape index: {}]   ;;  %s727_s4 = inlined_call_operand.vmem [shape: f32[1,32], index: 4, kind: input, shape index: {}]   ;;  %s728_s5 = inlined_call_operand.vmem [shape: f32[16,32], index: 5, kind: output, shape index: {}]  }
   0x1   :  { %v422_v0 = vld [vmem:[%s723_s1 + $0x18] sm:$0xf]  ;;  %v525_v1 = vld [vmem:[%s723_s1 + $0x20] sm:$0xf0]  ;;  %v410_v2 = vld [vmem:[%s723_s1] sm:$0xf] }
   0x2   :  { %v423_v3 = vor.u32 %v525_v1, %v422_v0  ;;  %v522_v4 = vld [vmem:[%s723_s1 + $0x8] sm:$0xf0]  ;;  %v524_v5 = vld [vmem:[%s723_s1 + $0x1c] sm:$0xf]  ;;  %v424_v6 = vld [vmem:[%s723_s1 + $0x24] sm:$0xf0] }
   0x3   :  { %v427_v7 = vor.u32 %v524_v5, %v424_v6  ;;  %v430_v8 = vld [vmem:[%s723_s1 + $0x20] sm:$0xf]  ;;  %v526_v9 = vld [vmem:[%s723_s1 + $0x28] sm:$0xf0]  ;;  %v411_v10 = vor.u32 %v522_v4, %v410_v2  ;;  %v521_v11 = vld [vmem:[%s723_s1 + $0x4] sm:$0xf]  ;;  %v341_v2 = vlaneseq }
   0x4   :  { %86 = vmatpush.bf16.msra.mxu2 %v423_v3  ;;  %v412_v12 = vld [vmem:[%s723_s1 + $0xc] sm:$0xf0]  ;;  %v431_v13 = vor.u32 %v526_v9, %v430_v8  ;;  %v542_v15 = vld [vmem:[%s724_s3 + $0x78] sm:$0xff]  ;;  %v418_v17 = vld [vmem:[%s723_s1 + $0x8] sm:$0xf] }
   0x5   :  { %100 = vmatpush.bf16.msra.mxu1 %v427_v7  ;;  %v415_v14 = vor.u32 %v521_v11, %v412_v12  ;;  %v534_v16 = vld [vmem:[%s724_s3 + $0x38] sm:$0xff]  ;;  %v523_v18 = vld [vmem:[%s723_s1 + $0x10] sm:$0xf0]  ;;  %v520_v19 = vld [vmem:[%s725_s0] sm:$0xff]  ;;  %313 = vmatpush.bf16.msra.mxu0 %v542_v15  ;;  %v694_v5 = vand.u32 127, %v341_v2 }
   0x6   :  { %299 = vmatpush.bf16.msra.mxu3 %v534_v16  ;;  %v541_v20 = vld [vmem:[%s724_s3 + $0x70] sm:$0xff]  ;;  %v419_v22 = vor.u32 %v523_v18, %v418_v17  ;;  %v540_v23 = vld [vmem:[%s724_s3 + $0x68] sm:$0xff]  ;;  %v539_v25 = vld [vmem:[%s724_s3 + $0x60] sm:$0xff] }
   0x7   :  { %v533_v21 = vld [vmem:[%s724_s3 + $0x30] sm:$0xff]  ;;  %v532_v24 = vld [vmem:[%s724_s3 + $0x28] sm:$0xff]  ;;  %v531_v26 = vld [vmem:[%s724_s3 + $0x20] sm:$0xff]  ;;  %vm343_vm2 = vcmp.lt.s32.totalorder %v694_v5, 4  ;;  %vm391_vm6 = vcmp.lt.s32.totalorder %v694_v5, 18  ;;  %vm390_vm8 = vcmp.lt.s32.totalorder %v694_v5, 6 }
   0x8   :  { %87 = vmatpush.bf16.msra.mxu2 %v411_v10  ;;  %v538_v27 = vld [vmem:[%s724_s3 + $0x58] sm:$0xff]  ;;  %v537_v29 = vld [vmem:[%s724_s3 + $0x50] sm:$0xff]  ;;  %v536_v31 = vld [vmem:[%s724_s3 + $0x48] sm:$0xff] }
   0x9   :  { %101 = vmatpush.bf16.msra.mxu1 %v415_v14  ;;  %314 = vmatpush.bf16.msra.mxu0 %v541_v20  ;;  %v530_v28 = vld [vmem:[%s724_s3 + $0x18] sm:$0xff]  ;;  %v529_v30 = vld [vmem:[%s724_s3 + $0x10] sm:$0xff]  ;;  %v528_v32 = vld [vmem:[%s724_s3 + $0x8] sm:$0xff] }
   0xa   :  { %300 = vmatpush.bf16.msra.mxu3 %v533_v21  ;;  %v535_v33 = vld [vmem:[%s724_s3 + $0x40] sm:$0xff]  ;;  %v546_v35 = vld [vmem:[%s724_s3 + $0x98] sm:$0xff]  ;;  %v545_v36 = vld [vmem:[%s724_s3 + $0x90] sm:$0xff] }
   0xb   :  { %432 = vmatmul.msk.bf16.vlgmr.msra.gmra.mxu2 %vm76_vm0, %v520_v19  ;;  %v527_v34 = vld [vmem:[%s724_s3] sm:$0xff]  ;;  %v544_v37 = vld [vmem:[%s724_s3 + $0x88] sm:$0xff] }
   0xc   :  { %114 = vmatpush.bf16.msrb.mxu2 %v431_v13  ;;  %433 = vmatmul.msk.bf16.vlgmr.msra.gmra.mxu1 %vm76_vm0, %v520_v19  ;;  %v543_v38 = vld [vmem:[%s724_s3 + $0x80] sm:$0xff] }
   0xd   :  { %315 = vmatpush.bf16.msra.mxu0 %v540_v23  ;;  %331 = vmatpush.bf16.msrb.mxu1 %v546_v35  ;;  %v31_v39 = vld [vmem:[%s726_s2] sm:$0x7] }
   0xe   :  { %301 = vmatpush.bf16.msra.mxu3 %v532_v24  ;;  %v34_v41 = vperm.slane %v31_v39, 1  ;;  %v33_v44 = vperm.slane %v31_v39, 0  ;;  %v35_v57 = vperm.slane %v31_v39, 2  ;;  %v547_v1 = vld [vmem:[%s727_s4] ss:$0 sm:$0xff] }
  0x10   :  { %115 = vmatpush.bf16.msrb.mxu2 %v419_v22 }
  0x11   :  { %316 = vmatpush.bf16.msra.mxu0 %v539_v25  ;;  %332 = vmatpush.bf16.msrb.mxu1 %v545_v36 }
  0x12   :  { %302 = vmatpush.bf16.msra.mxu3 %v531_v26 }
  0x15   :  { %317 = vmatpush.bf16.msra.mxu0 %v538_v27  ;;  %333 = vmatpush.bf16.msrb.mxu1 %v544_v37 }
  0x16   :  { %303 = vmatpush.bf16.msra.mxu3 %v530_v28 }
  0x19   :  { %318 = vmatpush.bf16.msra.mxu0 %v537_v29  ;;  %334 = vmatpush.bf16.msrb.mxu1 %v543_v38 }
  0x1a   :  { %304 = vmatpush.bf16.msra.mxu3 %v529_v30 }
  0x1b   :  { %434 = vmatmul.msk.bf16.vlgmr.msrb.gmra.mxu2 %vm76_vm0, %v520_v19 }
  0x1d   :  { %319 = vmatpush.bf16.msra.mxu0 %v536_v31 }
  0x1e   :  { %305 = vmatpush.bf16.msra.mxu3 %v528_v32 }
  0x21   :  { %320 = vmatpush.bf16.msra.mxu0 %v535_v33 }
  0x22   :  { %306 = vmatpush.bf16.msra.mxu3 %v527_v34 }
  0x89   :  { %v103_v40 = vpop.f32.mrf.mxu1 }
  0x8a   :  { %v104_v42 = vadd.f32 %v103_v40, %v34_v41 }
  0x8c   :  { %v123_v46 = vmax.f32 %v104_v42, 0.0 }
  0x8e   :  { %v89_v43 = vpop.f32.mrf.mxu2 }
  0x8f   :  { %v90_v49 = vadd.f32 %v89_v43, %v33_v44 }
  0x91   :  { %v105_v45 = vpop.f32.mrf.mxu1  ;;  %v122_v53 = vmax.f32 %v90_v49, 0.0 }
  0x92   :  { %v106_v47 = vadd.f32 %v105_v45, %v34_v41 }
  0x94   :  { %v126_v48 = vmax.f32 %v106_v47, 0.0 }
  0x96   :  { %v91_v50 = vpop.f32.mrf.mxu2  ;;  %v129_v51 = vpack.c.bf16 %v126_v48, %v123_v46 }
  0x97   :  { %v92_v52 = vadd.f32 %v91_v50, %v33_v44 }
  0x98   :  { %321 = vmatmul.bf16.vlgmr.msra.gmra.mxu0 %v129_v51 }
  0x99   :  { %v125_v54 = vmax.f32 %v92_v52, 0.0 }
  0x9b   :  { %v128_v55 = vpack.c.bf16 %v125_v54, %v122_v53 }
  0x9d   :  { %307 = vmatmul.bf16.vlgmr.msra.gmra.mxu3 %v128_v55 }
  0x9e   :  { %v117_v56 = vpop.f32.mrf.mxu2 }
  0x9f   :  { %v118_v58 = vadd.f32 %v117_v56, %v35_v57 }
  0xa1   :  { %v124_v61 = vmax.f32 %v118_v58, 0.0 }
  0xa6   :  { %v119_v59 = vpop.f32.mrf.mxu2 }
  0xa7   :  { %v120_v60 = vadd.f32 %v119_v59, %v35_v57 }
  0xa9   :  { %v127_v62 = vmax.f32 %v120_v60, 0.0 }
  0xab   :  { %v130_v63 = vpack.c.bf16 %v127_v62, %v124_v61 }
  0xad   :  { %515 = vmatmul.msk.bf16.vlgmr.msrb.gmra.mxu1 %vm295_vm1, %v130_v63 }
 0x115   :  { %v322_v4 = vpop.f32.mrf.mxu0 }
 0x11d   :  { %v324_v13 = vpop.f32.mrf.mxu0 }
 0x120   :  { %v308_v0 = vpop.f32.mrf.mxu3 }
 0x121   :  { %v309_v3 = vadd.f32 %v547_v1, %v308_v0 }
 0x123   :  { %v323_v6 = vadd.f32 %v322_v4, %v309_v3 }
 0x128   :  { %v310_v7 = vpop.f32.mrf.mxu3 }
 0x129   :  { %v311_v10 = vadd.f32 %v547_v1, %v310_v7 }
 0x12a   :  { %v336_v8 = vpop.f32.mrf.mxu1 }
 0x12b   :  { %v337_v9 = vadd.f32 %v336_v8, %v323_v6  ;;  %v325_v15 = vadd.f32 %v324_v13, %v311_v10 }
 0x12d   :  { %v344_v11 = vmul.f32 2.0, %v337_v9 }
 0x12f   :  { %v346_v12 = vsel %vm343_vm2, %v344_v11, %v337_v9 }
 0x130   :  { %v516_v14 = vmul.f32 -1.442695, %v346_v12 }
 0x132   :  { %548 = vpow2.f32 %v516_v14  ;;  %v338_v16 = vpop.f32.mrf.mxu1 }
 0x133   :  { %v339_v17 = vadd.f32 %v338_v16, %v325_v15 }
 0x135   :  { %v345_v18 = vmul.f32 2.0, %v339_v17 }
 0x137   :  { %v347_v19 = vsel %vm343_vm2, %v345_v18, %v339_v17 }
 0x138   :  { %v549_v20 = vpop.eup %548  ;;  %v517_v21 = vmul.f32 -1.442695, %v347_v19 }
 0x139   :  { %v354_v22 = vadd.f32 1.0, %v549_v20 }
 0x13a   :  { %550 = vpow2.f32 %v517_v21 }
 0x13b   :  { %552 = vrcp.f32 %v354_v22  ;;  %v367_v28 = vand.u32 2147483648, %v354_v22  ;;  %v365_v30 = vand.u32 2147483647, %v354_v22  ;;  %vm361_vm4 = vweird.f32 %v354_v22 }
 0x13d   :  { %v368_v33 = vor.u32 1.1754944e-38, %v367_v28  ;;  %vm366_vm7 = vcmp.eq.f32.partialorder %v365_v30, 8.507059e+37 }
 0x140   :  { %v551_v23 = vpop.eup %550 }
 0x141   :  { %v553_v24 = vpop.eup %552  ;;  %v355_v25 = vadd.f32 1.0, %v551_v23 }
 0x142   :  { %v357_v26 = vmul.f32 %v553_v24, %v354_v22  ;;  %vm362_vm3 = vweird.f32 %v553_v24 }
 0x143   :  { %554 = vrcp.f32 %v355_v25  ;;  %vm363_vm5 = vmor %vm361_vm4, %vm362_vm3  ;;  %v382_v40 = vand.u32 2147483648, %v355_v25  ;;  %v380_v43 = vand.u32 2147483647, %v355_v25  ;;  %vm376_vm10 = vweird.f32 %v355_v25 }
 0x144   :  { %v358_v27 = vsub.f32 1.0, %v357_v26 }
 0x145   :  { %v383_v47 = vor.u32 1.1754944e-38, %v382_v40  ;;  %vm381_vm12 = vcmp.eq.f32.partialorder %v380_v43, 8.507059e+37 }
 0x146   :  { %v359_v29 = vmul.f32 %v553_v24, %v358_v27 }
 0x148   :  { %v360_v31 = vadd.f32 %v553_v24, %v359_v29 }
 0x149   :  { %v555_v32 = vpop.eup %554 }
 0x14a   :  { %v364_v34 = vsel %vm363_vm5, %v553_v24, %v360_v31  ;;  %v372_v35 = vmul.f32 %v555_v32, %v355_v25  ;;  %vm377_vm9 = vweird.f32 %v555_v32 }
 0x14b   :  { %v369_v36 = vsel %vm366_vm7, %v368_v33, %v364_v34  ;;  %vm378_vm11 = vmor %vm376_vm10, %vm377_vm9 }
 0x14c   :  { %v386_v37 = vmul.f32 2.0, %v369_v36  ;;  %v392_v38 = vsel %vm391_vm6, %v337_v9, %v369_v36  ;;  %v373_v39 = vsub.f32 1.0, %v372_v35 }
 0x14d   :  { %v394_v44 = vsel %vm390_vm8, %v369_v36, %v392_v38 }
 0x14e   :  { %v518_v41 = vadd.f32 -1.0, %v386_v37  ;;  %v374_v42 = vmul.f32 %v555_v32, %v373_v39 }
 0x150   :  { %v396_v45 = vsel %vm343_vm2, %v518_v41, %v394_v44  ;;  %v375_v46 = vadd.f32 %v555_v32, %v374_v42 }
 0x151   :  { %398 = vst.msk [vmem:[%s728_s5] sm:$0xff] %vm76_vm0, %v396_v45 }
 0x152   :  { %v379_v48 = vsel %vm378_vm11, %v555_v32, %v375_v46 }
 0x153   :  { %v384_v49 = vsel %vm381_vm12, %v383_v47, %v379_v48 }
 0x154   :  { %v387_v50 = vmul.f32 2.0, %v384_v49  ;;  %v393_v51 = vsel %vm391_vm6, %v339_v17, %v384_v49 }
 0x155   :  { %v395_v53 = vsel %vm390_vm8, %v384_v49, %v393_v51 }
 0x156   :  { %v519_v52 = vadd.f32 -1.0, %v387_v50 }
 0x158   :  { %v397_v54 = vsel %vm343_vm2, %v519_v52, %v395_v53 }
 0x159   :  { %399 = vst.msk [vmem:[%s728_s5 + $0x8] sm:$0xff] %vm76_vm0, %v397_v54 }

</bundles_post_ra>
